<compile_context>
chip_gen: v5e
topology: v5e:2x2
jax: 0.10.0
libtpu: 0.0.40
codegen_flags: <defaults>
</compile_context>

<pallas_src>
import jax
import jax.numpy as jnp
from jax.experimental import pallas as pl
from jax.experimental.pallas import tpu as pltpu

_LANE = 128


def _multi_output_kernel(x_ref, o2_ref, o4_ref, o8_ref, o16_ref, o32_ref):
    x = x_ref[...]
    o2_ref[...] = x * 2
    o4_ref[...] = x * 4
    o8_ref[...] = x * 8
    o16_ref[...] = x * 16
    o32_ref[...] = x * 32


def _tile_rows_and_vmem_limit():
    """Per-generation (tile_rows, vmem_limit_bytes) for the 128-lane tiling.

    12 pipeline buffers total (1 input + 5 outputs, double-buffered), each
    tile_rows * 128 * 4 bytes.
    """
    try:
        kind = jax.devices()[0].device_kind.lower()
    except Exception:  # pragma: no cover - defensive; default is safe.
        kind = ""
    if "v7" in kind:
        # 4096 rows -> 2 MiB/buffer, 24 MiB of pipeline buffers.  Do not go
        # larger: v7x only has 64 MiB physical VMEM per TensorCore.
        return 4096, 32 << 20
    # v5e / v6e (and older): 8192 rows -> 4 MiB/buffer, ~48 MiB of buffers.
    # Physical VMEM is 128 MiB, so a 64 MiB scoped limit is safe.
    return 8192, 64 << 20


def model_with_5_output(x):
    """Elementwise 5-output op: returns (x*2, x*4, x*8, x*16, x*32)."""
    orig_shape = x.shape
    total = int(x.size)
    dtype = x.dtype
    itemsize = jnp.dtype(dtype).itemsize

    tile_rows, vmem_limit = _tile_rows_and_vmem_limit()

    cost = pl.CostEstimate(
        flops=5 * total,
        transcendentals=0,
        bytes_accessed=6 * total * itemsize,  # 1 read + 5 writes, no extras.
    )
    compiler_params = pltpu.CompilerParams(
        # "parallel" lets v7x shard row tiles over its 2 TensorCores; verify
        # with xprof and switch to pltpu.CORE_PARALLEL if it does not.
        dimension_semantics=("parallel",),
        vmem_limit_bytes=vmem_limit,
    )

    if total % _LANE == 0:
        # Common case: lane-dense 2-D view [rows, 128]; partial last row-block
        # (if rows % tile_rows != 0) is handled by the pipeline.
        rows = total // _LANE
        x_view = x.reshape(rows, _LANE)
        block_rows = rows if rows <= tile_rows else tile_rows
        grid = (pl.cdiv(rows, block_rows),)
        spec = pl.BlockSpec((block_rows, _LANE), lambda i: (i, 0))
        out_sds = jax.ShapeDtypeStruct((rows, _LANE), dtype)
    else:
        # Ragged case: flat 1-D view with a partial last block.  No pad and no
        # post-slices -> no extra HBM passes; the OOB tail of the last block's
        # output DMAs is trimmed automatically.
        x_view = x.reshape(-1)
        tile_elems = tile_rows * _LANE
        block_elems = total if total <= tile_elems else tile_elems
        grid = (pl.cdiv(total, block_elems),)
        spec = pl.BlockSpec((block_elems,), lambda i: (i,))
        out_sds = jax.ShapeDtypeStruct((total,), dtype)

    outs = pl.pallas_call(
        _multi_output_kernel,
        out_shape=(out_sds,) * 5,
        grid=grid,
        in_specs=[spec],
        out_specs=(spec,) * 5,
        compiler_params=compiler_params,
        cost_estimate=cost,
    )(x_view)

    # Pure reshape back to the original NCHW layout (free, no HBM pass).
    return tuple(o.reshape(orig_shape) for o in outs)


if __name__ == "__main__":
    key = jax.random.PRNGKey(0)
    x = jax.random.normal(key, (2, 4, 16, 16), dtype=jnp.float32)

    outs = model_with_5_output(x)
    outs = jax.block_until_ready(outs)

    # Validate against the reference semantics: (x*2, x*4, x*8, x*16, x*32).
    scales = (2.0, 4.0, 8.0, 16.0, 32.0)
    assert len(outs) == 5
    for o, s in zip(outs, scales):
        assert o.shape == x.shape and o.dtype == x.dtype
        assert jnp.allclose(o, x * s), f"mismatch for scale {s}"

    print("KERNEL_OK")
</pallas_src>

<mosaic_0001>
module attributes {stable_mosaic.version = 11 : i64} {
  func.func @_multi_output_kernel(%arg0: i32, %arg1: memref<16x128xf32, #tpu.memory_space<vmem>>, %arg2: memref<16x128xf32, #tpu.memory_space<vmem>>, %arg3: memref<16x128xf32, #tpu.memory_space<vmem>>, %arg4: memref<16x128xf32, #tpu.memory_space<vmem>>, %arg5: memref<16x128xf32, #tpu.memory_space<vmem>>, %arg6: memref<16x128xf32, #tpu.memory_space<vmem>>) attributes {dimension_semantics = [#tpu.dimension_semantics<parallel>], iteration_bounds = array<i64: 1>, scalar_prefetch = 0 : i64, scratch_operands = 0 : i64, tpu.core_type = #tpu.core_type<tc>, window_params = [{transform_indices = @transform_0, window_bounds = array<i64: 16, 128>}, {transform_indices = @transform_1, window_bounds = array<i64: 16, 128>}, {transform_indices = @transform_2, window_bounds = array<i64: 16, 128>}, {transform_indices = @transform_3, window_bounds = array<i64: 16, 128>}, {transform_indices = @transform_4, window_bounds = array<i64: 16, 128>}, {transform_indices = @transform_5, window_bounds = array<i64: 16, 128>}]} {
    %c0 = arith.constant 0 : index
    %c0_0 = arith.constant 0 : index
    %0 = vector.load %arg1[%c0, %c0_0] : memref<16x128xf32, #tpu.memory_space<vmem>>, vector<16x128xf32>
    %cst = arith.constant 2.000000e+00 : f32
    %1 = vector.broadcast %cst : f32 to vector<16x128xf32>
    %2 = arith.mulf %0, %1 : vector<16x128xf32>
    %c0_1 = arith.constant 0 : index
    %c0_2 = arith.constant 0 : index
    %3 = vector.load %arg2[%c0_1, %c0_2] : memref<16x128xf32, #tpu.memory_space<vmem>>, vector<16x128xf32>
    tpu.vector_store %arg2[%c0_1, %c0_2], %2 {strides = array<i32>} : memref<16x128xf32, #tpu.memory_space<vmem>>, vector<16x128xf32>,
    %cst_3 = arith.constant 4.000000e+00 : f32
    %4 = vector.broadcast %cst_3 : f32 to vector<16x128xf32>
    %5 = arith.mulf %0, %4 : vector<16x128xf32>
    %c0_4 = arith.constant 0 : index
    %c0_5 = arith.constant 0 : index
    %6 = vector.load %arg3[%c0_4, %c0_5] : memref<16x128xf32, #tpu.memory_space<vmem>>, vector<16x128xf32>
    tpu.vector_store %arg3[%c0_4, %c0_5], %5 {strides = array<i32>} : memref<16x128xf32, #tpu.memory_space<vmem>>, vector<16x128xf32>,
    %cst_6 = arith.constant 8.000000e+00 : f32
    %7 = vector.broadcast %cst_6 : f32 to vector<16x128xf32>
    %8 = arith.mulf %0, %7 : vector<16x128xf32>
    %c0_7 = arith.constant 0 : index
    %c0_8 = arith.constant 0 : index
    %9 = vector.load %arg4[%c0_7, %c0_8] : memref<16x128xf32, #tpu.memory_space<vmem>>, vector<16x128xf32>
    tpu.vector_store %arg4[%c0_7, %c0_8], %8 {strides = array<i32>} : memref<16x128xf32, #tpu.memory_space<vmem>>, vector<16x128xf32>,
    %cst_9 = arith.constant 1.600000e+01 : f32
    %10 = vector.broadcast %cst_9 : f32 to vector<16x128xf32>
    %11 = arith.mulf %0, %10 : vector<16x128xf32>
    %c0_10 = arith.constant 0 : index
    %c0_11 = arith.constant 0 : index
    %12 = vector.load %arg5[%c0_10, %c0_11] : memref<16x128xf32, #tpu.memory_space<vmem>>, vector<16x128xf32>
    tpu.vector_store %arg5[%c0_10, %c0_11], %11 {strides = array<i32>} : memref<16x128xf32, #tpu.memory_space<vmem>>, vector<16x128xf32>,
    %cst_12 = arith.constant 3.200000e+01 : f32
    %13 = vector.broadcast %cst_12 : f32 to vector<16x128xf32>
    %14 = arith.mulf %0, %13 : vector<16x128xf32>
    %c0_13 = arith.constant 0 : index
    %c0_14 = arith.constant 0 : index
    %15 = vector.load %arg6[%c0_13, %c0_14] : memref<16x128xf32, #tpu.memory_space<vmem>>, vector<16x128xf32>
    tpu.vector_store %arg6[%c0_13, %c0_14], %14 {strides = array<i32>} : memref<16x128xf32, #tpu.memory_space<vmem>>, vector<16x128xf32>,
    return
  }
  func.func @transform_0(%arg0: i32) -> (i32, i32) {
    %c0_i32 = arith.constant 0 : i32
    %c0_i32_0 = arith.constant 0 : i32
    return %arg0, %c0_i32 : i32, i32
  }
  func.func @transform_1(%arg0: i32) -> (i32, i32) {
    %c0_i32 = arith.constant 0 : i32
    %c0_i32_0 = arith.constant 0 : i32
    return %arg0, %c0_i32 : i32, i32
  }
  func.func @transform_2(%arg0: i32) -> (i32, i32) {
    %c0_i32 = arith.constant 0 : i32
    %c0_i32_0 = arith.constant 0 : i32
    return %arg0, %c0_i32 : i32, i32
  }
  func.func @transform_3(%arg0: i32) -> (i32, i32) {
    %c0_i32 = arith.constant 0 : i32
    %c0_i32_0 = arith.constant 0 : i32
    return %arg0, %c0_i32 : i32, i32
  }
  func.func @transform_4(%arg0: i32) -> (i32, i32) {
    %c0_i32 = arith.constant 0 : i32
    %c0_i32_0 = arith.constant 0 : i32
    return %arg0, %c0_i32 : i32, i32
  }
  func.func @transform_5(%arg0: i32) -> (i32, i32) {
    %c0_i32 = arith.constant 0 : i32
    %c0_i32_0 = arith.constant 0 : i32
    return %arg0, %c0_i32 : i32, i32
  }
}

</mosaic_0001>

<bundles_post_ra>
// kernel: tpu_custom_call.1
= control target key start
LH: loop header
LB: loop body
LE: loop exit
PB: predicated region body
PF: predicated region fallthrough
CT: control target
= control target key end

     0   :  { %11 = vsyncpa [#allocation3], 0  ;;  %s389_s0 = inlined_call_operand.hbm [shape: f32[16,128], index: 0, kind: input, shape index: {}]   ;;  %s390_s1 = inlined_call_operand.hbm [shape: f32[16,128], index: 1, kind: output, shape index: {0}]   ;;  %s391_s2 = inlined_call_operand.hbm [shape: f32[16,128], index: 2, kind: output, shape index: {1}]   ;;  %s392_s3 = inlined_call_operand.hbm [shape: f32[16,128], index: 3, kind: output, shape index: {2}]   ;;  %s393_s4 = inlined_call_operand.hbm [shape: f32[16,128], index: 4, kind: output, shape index: {3}]   ;;  %s394_s5 = inlined_call_operand.hbm [shape: f32[16,128], index: 5, kind: output, shape index: {4}]  }
   0x1   :  { %12 = vsyncpa [#allocation4], 0 }
   0x2   :  { %13 = vsyncpa [#allocation7], 0 }
   0x3   :  { %14 = vsyncpa [#allocation10], 0  ;;  %s19_s20 = sshll.u32 %s389_s0, 4  ;;  %s303_s21 = smov [#allocation2]   ;;  %s20_s20 = int_to_ptr.hbm [resolvable:$true] %s19_s20 }
   0x4   :  { %s21_s22 = sshll.u32 %s303_s21, 4  ;;  %s304_s23 = smov 128   ;;  %s22_s22 = int_to_ptr.vmem [resolvable:$true] %s21_s22 }
   0x5   :  { %s305_s24 = smov 8  }
   0x6   :  { %27 = dma.hbm_to_vmem [thread:$0]  %s20_s20, 256, %s22_s22, [#allocation3], %s304_s23, %s304_s23, %s305_s24  }
   0x7   :  { %295 = dma.done.wait [#allocation3], 256  }
   0x8   :  { %296 = vsyncadd [#allocation3], 4294967040  ;;  %s73_s27 = sshll.u32 %s391_s2, 4  ;;  %s306_s28 = smov [#allocation6]   ;;  %v32_v0 = vld [vmem:[#allocation2] sm:$0xff]  ;;  %v33_v1 = vld [vmem:[#allocation2 + $0x8] sm:$0xff]  ;;  %s352_s27 = int_to_ptr.hbm [resolvable:$true] %s73_s27 }
   0x9   :  { %s350_s29 = sshll.u32 %s306_s28, 4  ;;  %s307_s0 = smov [#allocation9]   ;;  %v38_v2 = vmul.f32 4.0, %v32_v0  ;;  %v39_v3 = vmul.f32 4.0, %v33_v1  ;;  %v46_v4 = vmul.f32 16.0, %v32_v0  ;;  %v47_v5 = vmul.f32 16.0, %v33_v1  ;;  %s72_s29 = int_to_ptr.vmem [resolvable:$true] %s350_s29 }
   0xa   :  { %s354_s30 = sshll.u32 %s307_s0, 4  ;;  %s99_s8 = sshll.u32 %s393_s4, 4  ;;  %v34_v6 = vmul.f32 2.0, %v32_v0  ;;  %v35_v7 = vmul.f32 2.0, %v33_v1  ;;  %v42_v8 = vmul.f32 8.0, %v32_v0  ;;  %v43_v9 = vmul.f32 8.0, %v33_v1  ;;  %s98_s30 = int_to_ptr.vmem [resolvable:$true] %s354_s30  ;;  %s100_s8 = int_to_ptr.hbm [resolvable:$true] %s99_s8 }
   0xb   :  { %s60_s11 = sshll.u32 %s390_s1, 4  ;;  %s308_s2 = smov [#allocation5]   ;;  %40 = vst [vmem:[#allocation6] sm:$0xff] %v38_v2  ;;  %v50_v10 = vmul.f32 32.0, %v32_v0  ;;  %v51_v11 = vmul.f32 32.0, %v33_v1  ;;  %s61_s11 = int_to_ptr.hbm [resolvable:$true] %s60_s11 }
   0xc   :  { %s363_s12 = sshll.u32 %s308_s2, 4  ;;  %41 = vst [vmem:[#allocation6 + $0x8] sm:$0xff] %v39_v3  ;;  %s309_s1 = smov [#allocation8]   ;;  %s59_s12 = int_to_ptr.vmem [resolvable:$true] %s363_s12 }
   0xd   :  { %s84_s4 = sshll.u32 %s309_s1, 4  ;;  %s86_s15 = sshll.u32 %s392_s3, 4  ;;  %48 = vst [vmem:[#allocation9] sm:$0xff] %v46_v4  ;;  %s85_s4 = int_to_ptr.vmem [resolvable:$true] %s84_s4  ;;  %s87_s15 = int_to_ptr.hbm [resolvable:$true] %s86_s15 }
   0xe   :  { %79 = dma.vmem_to_hbm [thread:$0]  %s72_s29, 256, %s352_s27, [#allocation7], %s304_s23, %s304_s23, %s305_s24   ;;  %49 = vst [vmem:[#allocation9 + $0x8] sm:$0xff] %v47_v5 }
   0xf   :  { %s310_s16 = smov [#allocation11]   ;;  %s112_s20 = sshll.u32 %s394_s5, 4  ;;  %36 = vst [vmem:[#allocation5] sm:$0xff] %v34_v6  ;;  %s113_s20 = int_to_ptr.hbm [resolvable:$true] %s112_s20 }
  0x10   :  { %s110_s17 = sshll.u32 %s310_s16, 4  ;;  %37 = vst [vmem:[#allocation5 + $0x8] sm:$0xff] %v35_v7  ;;  %s111_s17 = int_to_ptr.vmem [resolvable:$true] %s110_s17 }
  0x11   :  { %105 = dma.vmem_to_hbm [thread:$0]  %s98_s30, 256, %s100_s8, [#allocation10], %s304_s23, %s304_s23, %s305_s24   ;;  %44 = vst [vmem:[#allocation8] sm:$0xff] %v42_v8 }
  0x12   :  { %66 = dma.vmem_to_hbm [thread:$0]  %s59_s12, 256, %s61_s11, [#allocation4], %s304_s23, %s304_s23, %s305_s24   ;;  %45 = vst [vmem:[#allocation8 + $0x8] sm:$0xff] %v43_v9 }
  0x13   :  { %52 = vst [vmem:[#allocation11] sm:$0xff] %v50_v10  ;;  %92 = dma.vmem_to_hbm [thread:$0]  %s85_s4, 256, %s87_s15, [#allocation7], %s304_s23, %s304_s23, %s305_s24  }
  0x14   :  { %53 = vst [vmem:[#allocation11 + $0x8] sm:$0xff] %v51_v11 }
  0x15   :  { %118 = dma.vmem_to_hbm [thread:$0]  %s111_s17, 256, %s113_s20, [#allocation10], %s304_s23, %s304_s23, %s305_s24  }
  0x16   :  { %297 = dma.done.wait [#allocation4], 256  }
  0x17   :  { %298 = vsyncadd [#allocation4], 4294967040 }
  0x18   :  { %299 = dma.done.wait [#allocation7], 512  }
  0x19   :  { %300 = vsyncadd [#allocation7], 4294966784 }
  0x1a   :  { %301 = dma.done.wait [#allocation10], 512  }
  0x1b   :  { %302 = vsyncadd [#allocation10], 4294966784 }
  0x1c   :  { %139 = vsyncpa [#allocation3], 1 }
  0x1d   :  { %140 = vsyncpa [#allocation4], 1 }
  0x1e   :  { %141 = vsyncpa [#allocation7], 1 }
  0x1f   :  { %142 = vsyncpa [#allocation10], 1 }

</bundles_post_ra>
